<compile_context>
chip_gen: v7x
topology: tpu7x:2x2x1
jax: 0.10.0
libtpu: 0.0.40
codegen_flags: <defaults>
</compile_context>

<pallas_src>
import functools

import jax
import jax.numpy as jnp
import numpy as np
from jax.experimental import pallas as pl
from jax.experimental.pallas import tpu as pltpu

# ----------------------------- module hyper-params -----------------------------
NUM_EMBEDDINGS = 16      # M
EMBEDDING_DIM = 4        # D_e  (== channel dim C of the input)
DECAY = 0.9
EPSILON = 1e-6
COMMITMENT_COST = 0.25

MAX_TILE = 8192          # tokens per grid step (sweep 2048-8192; VMEM use is tiny)


def _round_up(x, m):
    return (x + m - 1) // m * m


# --------------------------------- Pallas kernel --------------------------------
def _vq_kernel(x_ref, emb_ref, e2h_ref,
               q_ref, idx_ref, stats_ref, sqsum_ref,
               sq_acc_ref,
               *, dhw_valid, dhw_padded, tile):
    """One spatial tile of one batch element (channels-major) vs. the whole codebook.

    x_ref:     (C, TILE)     input columns (tokens on lanes)
    emb_ref:   (M, C)        codebook
    e2h_ref:   (M, 1)        0.5 * ||e_k||^2, hoisted to the wrapper
    q_ref:     (C, TILE)     quantized columns
    idx_ref:   (1, TILE)     argmin code index (int32), lane-dense
    stats_ref: (M, C+1)      per-batch [embed_sum | counts]  (accumulated over tiles)
    sqsum_ref: (1, 1)        per-batch sum((q - x)^2)        (written at last tile)
    sq_acc_ref:(1, TILE)     VMEM scratch, per-lane diff^2 accumulator
    """
    i = pl.program_id(1)              # spatial tile index (reduction / "arbitrary" axis)
    n_tiles = pl.num_programs(1)

    x = x_ref[...].astype(jnp.float32)        # (C, TILE)
    emb = emb_ref[...].astype(jnp.float32)    # (M, C)
    e2h = e2h_ref[...]                        # (M, 1)

    # scores = 0.5*||e||^2 - e.x  -> same argmin as the full squared distance
    dots = jnp.dot(emb, x, preferred_element_type=jnp.float32)       # (M, TILE) on MXU
    scores = e2h - dots                                              # (M, TILE)

    # argmin over the M (sublane) axis, first-occurrence tie-break like jnp.argmin
    code_ids = jax.lax.broadcasted_iota(jnp.int32, scores.shape, 0)  # (M, TILE)
    smin = jnp.min(scores, axis=0, keepdims=True)                    # (1, TILE)
    idx = jnp.min(jnp.where(scores == smin, code_ids, scores.shape[0]),
                  axis=0, keepdims=True)                             # (1, TILE) i32

    onehot = code_ids == idx                                         # (M, TILE) bool
    if dhw_valid < dhw_padded:   # static: mask out zero-padded token columns
        col = i * tile + jax.lax.broadcasted_iota(jnp.int32, (1, tile), 1)
        onehot = jnp.logical_and(onehot, col < dhw_valid)
    onehot = onehot.astype(jnp.float32)

    # quantized columns: emb^T @ onehot without materializing a transpose
    q = jax.lax.dot_general(emb, onehot, (((0,), (0,)), ((), ())),
                            preferred_element_type=jnp.float32)      # (C, TILE)
    q_ref[...] = q.astype(q_ref.dtype)
    idx_ref[...] = idx

    # accumulator init on this batch slice's first tile
    @pl.when(i == 0)
    def _():
        stats_ref[...] = jnp.zeros_like(stats_ref)
        sq_acc_ref[...] = jnp.zeros_like(sq_acc_ref)

    # fused embed_sum + counts on the MXU: contract onehot against [x ; 1]
    x_aug = jnp.concatenate(
        [x, jnp.ones((1, tile), jnp.float32)], axis=0)               # (C+1, TILE)
    stats_ref[...] += jax.lax.dot_general(
        onehot, x_aug, (((1,), (1,)), ((), ())),
        preferred_element_type=jnp.float32)                          # (M, C+1)

    # deferred MSE: per-lane accumulation; padded columns contribute exactly 0
    diff = q - x                                                     # (C, TILE)
    sq_acc_ref[...] += jnp.sum(diff * diff, axis=0, keepdims=True)   # (1, TILE)

    @pl.when(i == n_tiles - 1)
    def _():
        sqsum_ref[...] = jnp.sum(sq_acc_ref[...], keepdims=True)     # (1, 1)


def _vq_pallas(z3, embedding):
    """z3: (B, C, DHW) channels-major tokens per batch element.

    Returns quantized (B, C, DHW), idx (B, DHW), counts (M,), embed_sum (M, C),
    sqsum scalar."""
    b, c, dhw = z3.shape
    m = embedding.shape[0]

    # Balance tiles to the problem so padding is < 128 tokens per batch slice.
    n_tiles = pl.cdiv(dhw, MAX_TILE)
    tile = min(MAX_TILE, _round_up(pl.cdiv(dhw, n_tiles), 128))
    n_tiles = pl.cdiv(dhw, tile)
    dhw_pad = n_tiles * tile
    if dhw_pad != dhw:
        z3 = jnp.pad(z3, ((0, 0), (0, 0), (0, dhw_pad - dhw)))

    e2h = 0.5 * jnp.sum(embedding * embedding, axis=1, keepdims=True)   # (M, 1), hoisted

    kernel = functools.partial(
        _vq_kernel, dhw_valid=dhw, dhw_padded=dhw_pad, tile=tile)

    out_shapes = (
        jax.ShapeDtypeStruct((b, c, dhw_pad), z3.dtype),     # quantized (ch-major)
        jax.ShapeDtypeStruct((b, 1, dhw_pad), jnp.int32),    # indices (lane-dense)
        jax.ShapeDtypeStruct((b, m, c + 1), jnp.float32),    # per-batch [emb_sum|counts]
        jax.ShapeDtypeStruct((b, 1, 1), jnp.float32),        # per-batch sq-diff sum
    )
    grid_spec = pltpu.PrefetchScalarGridSpec(
        num_scalar_prefetch=0,
        grid=(b, n_tiles),
        in_specs=[
            pl.BlockSpec((None, c, tile), lambda bb, i: (bb, 0, i)),
            pl.BlockSpec((m, c), lambda bb, i: (0, 0)),
            pl.BlockSpec((m, 1), lambda bb, i: (0, 0)),
        ],
        out_specs=[
            pl.BlockSpec((None, c, tile), lambda bb, i: (bb, 0, i)),
            pl.BlockSpec((None, 1, tile), lambda bb, i: (bb, 0, i)),
            pl.BlockSpec((None, m, c + 1), lambda bb, i: (bb, 0, 0)),
            pl.BlockSpec((None, 1, 1), lambda bb, i: (bb, 0, 0)),
        ],
        scratch_shapes=[pltpu.VMEM((1, tile), jnp.float32)],
    )
    q3, idx3, stats, sqsum = pl.pallas_call(
        kernel,
        out_shape=out_shapes,
        grid_spec=grid_spec,
        compiler_params=pltpu.CompilerParams(
            dimension_semantics=("parallel", "arbitrary")),
    )(z3, embedding, e2h)

    embed_sum = jnp.sum(stats[:, :, :c], axis=0)     # (M, C)
    counts = jnp.sum(stats[:, :, c], axis=0)         # (M,)
    sqsum = jnp.sum(sqsum)                           # scalar
    if dhw_pad != dhw:
        q3 = q3[:, :, :dhw]
        idx3 = idx3[:, :, :dhw]
    return q3, idx3[:, 0, :], counts, embed_sum, sqsum


# ------------------------------ module-level wrapper -----------------------------
def vq_forward(z, embedding, cluster_size, embedding_avg, *, training=True):
    """Mirrors VectorQuantizerEMA.forward.

    z: (B, C, D, H, W) float32, C == EMBEDDING_DIM.
    Returns (quantized_st, total_loss, encoding_indices, perplexity, used_codes,
             new_embedding, new_cluster_size, new_embedding_avg).
    The last three are the updated EMA buffers (identity when training=False).
    """
    b, c, dd, h, w = z.shape
    m = embedding.shape[0]
    n_tokens = b * dd * h * w

    # forward() pins rows 0 and 1 of the codebook every call
    embedding = embedding.at[0].set(0.0)
    embedding = embedding.at[1].set(6.0)

    # channels-major token layout per batch element -- a FREE reshape (no transpose)
    z3 = z.reshape(b, c, dd * h * w)

    q3, idx3, counts, embed_sum, sqsum = _vq_pallas(z3, embedding)

    quantized = q3.reshape(b, c, dd, h, w)           # free reshape, no transpose
    encoding_indices = idx3.reshape(b, dd, h, w)

    avg_probs = counts / n_tokens
    perplexity = jnp.exp(-jnp.sum(avg_probs * jnp.log(avg_probs + 1e-10)))
    used_codes = jnp.sum(cluster_size > 1e-5).astype(jnp.float32) / m

    commitment_loss = COMMITMENT_COST * (sqsum / z.size)
    total_loss = commitment_loss

    quantized_st = z + jax.lax.stop_gradient(quantized - z)

    if training:  # EMA buffer updates (state only; does not change this call's outputs)
        new_cluster_size = DECAY * cluster_size + (1.0 - DECAY) * counts
        new_embedding_avg = DECAY * embedding_avg + (1.0 - DECAY) * embed_sum
        n_tot = jnp.sum(new_cluster_size)
        cs = (new_cluster_size + EPSILON) / (n_tot + m * EPSILON) * n_tot
        new_embedding = new_embedding_avg / (cs[:, None] + EPSILON)
    else:
        new_cluster_size, new_embedding_avg, new_embedding = (
            cluster_size, embedding_avg, embedding)

    return (quantized_st, total_loss, encoding_indices, perplexity, used_codes,
            new_embedding, new_cluster_size, new_embedding_avg)


# --------------------------------- pure-JAX reference ---------------------------------
def vq_reference(z, embedding, cluster_size):
    b, c, dd, h, w = z.shape
    m = embedding.shape[0]
    embedding = embedding.at[0].set(0.0)
    embedding = embedding.at[1].set(6.0)
    flat = jnp.transpose(z, (0, 2, 3, 4, 1)).reshape(-1, c)
    d2 = (jnp.sum(flat**2, 1, keepdims=True) + jnp.sum(embedding**2, 1)[None, :]
          - 2.0 * flat @ embedding.T)
    idx = jnp.argmin(d2, axis=1)
    enc = jax.nn.one_hot(idx, m, dtype=flat.dtype)
    q = enc @ embedding
    qr = jnp.transpose(q.reshape(b, dd, h, w, c), (0, 4, 1, 2, 3))
    avg_probs = enc.mean(0)
    perplexity = jnp.exp(-jnp.sum(avg_probs * jnp.log(avg_probs + 1e-10)))
    used = jnp.sum(cluster_size > 1e-5).astype(jnp.float32) / m
    loss = COMMITMENT_COST * jnp.mean((qr - z) ** 2)
    return qr, loss, idx.reshape(b, dd, h, w), perplexity, used


# -------------------------------------- main --------------------------------------
if __name__ == "__main__":
    key = jax.random.PRNGKey(0)
    k_emb, k_z = jax.random.split(key)

    # deterministic parameter / buffer init (mirrors __init__)
    emb = jax.random.normal(k_emb, (NUM_EMBEDDINGS, EMBEDDING_DIM), dtype=jnp.float32)
    emb = emb / jnp.linalg.norm(emb, axis=1, keepdims=True) * 0.1
    emb = emb.at[0].set(0.0)
    emb = emb.at[1].set(6.0)
    cluster_size = jnp.ones((NUM_EMBEDDINGS,), jnp.float32)
    embedding_avg = emb

    # small input consistent with forward(): (B, C, D, H, W), C == embedding_dim
    B, C, D, H, W = 2, EMBEDDING_DIM, 4, 8, 8     # DHW = 256 per batch element
    z = jax.random.normal(k_z, (B, C, D, H, W), dtype=jnp.float32)

    outs = vq_forward(z, emb, cluster_size, embedding_avg, training=True)
    outs = jax.block_until_ready(outs)
    q_st, loss, indices, perplexity, used_codes, new_emb, new_cs, new_avg = outs

    # correctness check against a pure-JAX reference
    q_ref, loss_ref, idx_ref, perp_ref, used_ref = vq_reference(z, emb, cluster_size)
    np.testing.assert_allclose(np.asarray(q_st), np.asarray(q_ref), rtol=1e-5, atol=1e-5)
    np.testing.assert_allclose(np.asarray(loss), np.asarray(loss_ref), rtol=1e-5, atol=1e-6)
    np.testing.assert_array_equal(np.asarray(indices), np.asarray(idx_ref))
    np.testing.assert_allclose(np.asarray(perplexity), np.asarray(perp_ref), rtol=1e-5)
    np.testing.assert_allclose(np.asarray(used_codes), np.asarray(used_ref), rtol=1e-6)

    print("KERNEL_OK")
</pallas_src>

<mosaic_0001>
module attributes {stable_mosaic.version = 11 : i64} {
  func.func @_vq_kernel(%arg0: i32, %arg1: i32, %arg2: memref<1x4x256xf32, #tpu.memory_space<vmem>>, %arg3: memref<16x4xf32, #tpu.memory_space<vmem>>, %arg4: memref<16x1xf32, #tpu.memory_space<vmem>>, %arg5: memref<1x4x256xf32, #tpu.memory_space<vmem>>, %arg6: memref<1x1x256xi32, #tpu.memory_space<vmem>>, %arg7: memref<1x16x5xf32, #tpu.memory_space<vmem>>, %arg8: memref<1x1x1xf32, #tpu.memory_space<vmem>>, %arg9: memref<1x256xf32, #tpu.memory_space<vmem>>) attributes {dimension_semantics = [#tpu.dimension_semantics<parallel>, #tpu.dimension_semantics<arbitrary>], iteration_bounds = array<i64: 2, 1>, scalar_prefetch = 0 : i64, scratch_operands = 1 : i64, tpu.core_type = #tpu.core_type<tc>, window_params = [{transform_indices = @transform_0, window_bounds = array<i64: 1, 4, 256>}, {pipeline_mode = #tpu.pipeline_mode<synchronous>, transform_indices = @transform_1, window_bounds = array<i64: 16, 4>}, {pipeline_mode = #tpu.pipeline_mode<synchronous>, transform_indices = @transform_2, window_bounds = array<i64: 16, 1>}, {transform_indices = @transform_3, window_bounds = array<i64: 1, 4, 256>}, {transform_indices = @transform_4, window_bounds = array<i64: 1, 1, 256>}, {transform_indices = @transform_5, window_bounds = array<i64: 1, 16, 5>}, {transform_indices = @transform_6, window_bounds = array<i64: 1, 1, 1>}]} {
    %c0 = arith.constant 0 : index
    %c0_0 = arith.constant 0 : index
    %c0_1 = arith.constant 0 : index
    %0 = vector.load %arg2[%c0, %c0_0, %c0_1] : memref<1x4x256xf32, #tpu.memory_space<vmem>>, vector<1x4x256xf32>
    %1 = vector.shape_cast %0 : vector<1x4x256xf32> to vector<4x256xf32>
    %c0_2 = arith.constant 0 : index
    %c0_3 = arith.constant 0 : index
    %2 = vector.load %arg3[%c0_2, %c0_3] : memref<16x4xf32, #tpu.memory_space<vmem>>, vector<16x4xf32>
    %c0_4 = arith.constant 0 : index
    %c0_5 = arith.constant 0 : index
    %3 = vector.load %arg4[%c0_4, %c0_5] : memref<16x1xf32, #tpu.memory_space<vmem>>, vector<16x1xf32>
    %cst = arith.constant dense<0.000000e+00> : vector<16x256xf32>
    %4 = tpu.matmul %2, %1, %cst {dimension_numbers = #tpu.dot_dimension_numbers<[1], [0], [0], [1], [0, 0, 1, 1], [], []>} : vector<16x4xf32>, vector<4x256xf32>, vector<16x256xf32> -> vector<16x256xf32>
    %5 = vector.broadcast %3 : vector<16x1xf32> to vector<16x256xf32>
    %6 = arith.subf %5, %4 : vector<16x256xf32>
    %7 = tpu.iota {dimensions = array<i32: 0>} : vector<16x256xi32>
    %cst_6 = arith.constant dense<0x7F800000> : vector<256xf32>
    %8 = vector.multi_reduction <minimumf>, %6, %cst_6 [0] : vector<16x256xf32> to vector<256xf32>
    %9 = vector.shape_cast %8 : vector<256xf32> to vector<1x256xf32>
    %10 = vector.broadcast %9 : vector<1x256xf32> to vector<16x256xf32>
    %11 = arith.cmpf oeq, %6, %10 : vector<16x256xf32>
    %c16_i32 = arith.constant 16 : i32
    %12 = vector.broadcast %c16_i32 : i32 to vector<16x256xi32>
    %13 = arith.select %11, %7, %12 : vector<16x256xi1>, vector<16x256xi32>
    %cst_7 = arith.constant dense<2147483647> : vector<256xi32>
    %14 = vector.multi_reduction <minsi>, %13, %cst_7 [0] : vector<16x256xi32> to vector<256xi32>
    %15 = vector.shape_cast %14 : vector<256xi32> to vector<1x256xi32>
    %16 = vector.broadcast %15 : vector<1x256xi32> to vector<16x256xi32>
    %17 = arith.cmpi eq, %7, %16 : vector<16x256xi32>
    %18 = arith.extui %17 : vector<16x256xi1> to vector<16x256xi32>
    %19 = arith.sitofp %18 : vector<16x256xi32> to vector<16x256xf32>
    %cst_8 = arith.constant dense<0.000000e+00> : vector<4x256xf32>
    %20 = tpu.matmul %2, %19, %cst_8 {dimension_numbers = #tpu.dot_dimension_numbers<[0], [0], [1], [1], [0, 1, 1, 1], [], []>} : vector<16x4xf32>, vector<16x256xf32>, vector<4x256xf32> -> vector<4x256xf32>
    %c0_9 = arith.constant 0 : index
    %c0_10 = arith.constant 0 : index
    %c0_11 = arith.constant 0 : index
    %21 = vector.load %arg5[%c0_9, %c0_10, %c0_11] : memref<1x4x256xf32, #tpu.memory_space<vmem>>, vector<1x4x256xf32>
    %22 = vector.shape_cast %21 : vector<1x4x256xf32> to vector<4x256xf32>
    %23 = vector.shape_cast %20 : vector<4x256xf32> to vector<1x4x256xf32>
    tpu.vector_store %arg5[%c0_9, %c0_10, %c0_11], %23 {strides = array<i32>} : memref<1x4x256xf32, #tpu.memory_space<vmem>>, vector<1x4x256xf32>,
    %c0_12 = arith.constant 0 : index
    %c0_13 = arith.constant 0 : index
    %c0_14 = arith.constant 0 : index
    %24 = vector.load %arg6[%c0_12, %c0_13, %c0_14] : memref<1x1x256xi32, #tpu.memory_space<vmem>>, vector<1x1x256xi32>
    %25 = vector.shape_cast %24 : vector<1x1x256xi32> to vector<1x256xi32>
    %26 = vector.shape_cast %15 : vector<1x256xi32> to vector<1x1x256xi32>
    tpu.vector_store %arg6[%c0_12, %c0_13, %c0_14], %26 {strides = array<i32>} : memref<1x1x256xi32, #tpu.memory_space<vmem>>, vector<1x1x256xi32>,
    %c0_i32 = arith.constant 0 : i32
    %27 = arith.cmpi eq, %arg1, %c0_i32 : i32
    %28 = arith.extui %27 : i1 to i32
    %c0_i32_15 = arith.constant 0 : i32
    %29 = arith.cmpi ne, %28, %c0_i32_15 : i32
    scf.if %29 {
      %cst_31 = arith.constant 0.000000e+00 : f32
      %49 = vector.broadcast %cst_31 : f32 to vector<16x5xf32>
      %c0_32 = arith.constant 0 : index
      %c0_33 = arith.constant 0 : index
      %c0_34 = arith.constant 0 : index
      %50 = vector.load %arg7[%c0_32, %c0_33, %c0_34] : memref<1x16x5xf32, #tpu.memory_space<vmem>>, vector<1x16x5xf32>
      %51 = vector.shape_cast %50 : vector<1x16x5xf32> to vector<16x5xf32>
      %52 = vector.shape_cast %49 : vector<16x5xf32> to vector<1x16x5xf32>
      tpu.vector_store %arg7[%c0_32, %c0_33, %c0_34], %52 {strides = array<i32>} : memref<1x16x5xf32, #tpu.memory_space<vmem>>, vector<1x16x5xf32>,
      %cst_35 = arith.constant 0.000000e+00 : f32
      %53 = vector.broadcast %cst_35 : f32 to vector<1x256xf32>
      %c0_36 = arith.constant 0 : index
      %c0_37 = arith.constant 0 : index
      %54 = vector.load %arg9[%c0_36, %c0_37] : memref<1x256xf32, #tpu.memory_space<vmem>>, vector<1x256xf32>
      tpu.vector_store %arg9[%c0_36, %c0_37], %53 {strides = array<i32>} : memref<1x256xf32, #tpu.memory_space<vmem>>, vector<1x256xf32>,
    } else {
    }
    %cst_16 = arith.constant 1.000000e+00 : f32
    %30 = vector.broadcast %cst_16 : f32 to vector<1x256xf32>
    %31 = tpu.concatenate %1, %30 in 0 : vector<4x256xf32>, vector<1x256xf32> -> vector<5x256xf32>
    %c0_17 = arith.constant 0 : index
    %c0_18 = arith.constant 0 : index
    %c0_19 = arith.constant 0 : index
    %32 = vector.load %arg7[%c0_17, %c0_18, %c0_19] : memref<1x16x5xf32, #tpu.memory_space<vmem>>, vector<1x16x5xf32>
    %33 = vector.shape_cast %32 : vector<1x16x5xf32> to vector<16x5xf32>
    %cst_20 = arith.constant dense<0.000000e+00> : vector<16x5xf32>
    %34 = tpu.matmul %19, %31, %cst_20 {dimension_numbers = #tpu.dot_dimension_numbers<[1], [1], [0], [0], [0, 0, 1, 0], [], []>} : vector<16x256xf32>, vector<5x256xf32>, vector<16x5xf32> -> vector<16x5xf32>
    %35 = arith.addf %33, %34 : vector<16x5xf32>
    %c0_21 = arith.constant 0 : index
    %c0_22 = arith.constant 0 : index
    %c0_23 = arith.constant 0 : index
    %36 = vector.load %arg7[%c0_21, %c0_22, %c0_23] : memref<1x16x5xf32, #tpu.memory_space<vmem>>, vector<1x16x5xf32>
    %37 = vector.shape_cast %36 : vector<1x16x5xf32> to vector<16x5xf32>
    %38 = vector.shape_cast %35 : vector<16x5xf32> to vector<1x16x5xf32>
    tpu.vector_store %arg7[%c0_21, %c0_22, %c0_23], %38 {strides = array<i32>} : memref<1x16x5xf32, #tpu.memory_space<vmem>>, vector<1x16x5xf32>,
    %39 = arith.subf %20, %1 : vector<4x256xf32>
    %c0_24 = arith.constant 0 : index
    %c0_25 = arith.constant 0 : index
    %40 = vector.load %arg9[%c0_24, %c0_25] : memref<1x256xf32, #tpu.memory_space<vmem>>, vector<1x256xf32>
    %41 = arith.mulf %39, %39 : vector<4x256xf32>
    %cst_26 = arith.constant dense<0.000000e+00> : vector<256xf32>
    %42 = vector.multi_reduction <add>, %41, %cst_26 [0] : vector<4x256xf32> to vector<256xf32>
    %43 = vector.shape_cast %42 : vector<256xf32> to vector<1x256xf32>
    %44 = arith.addf %40, %43 : vector<1x256xf32>
    %c0_27 = arith.constant 0 : index
    %c0_28 = arith.constant 0 : index
    %45 = vector.load %arg9[%c0_27, %c0_28] : memref<1x256xf32, #tpu.memory_space<vmem>>, vector<1x256xf32>
    tpu.vector_store %arg9[%c0_27, %c0_28], %44 {strides = array<i32>} : memref<1x256xf32, #tpu.memory_space<vmem>>, vector<1x256xf32>,
    %c0_i32_29 = arith.constant 0 : i32
    %46 = arith.cmpi eq, %arg1, %c0_i32_29 : i32
    %47 = arith.extui %46 : i1 to i32
    %c0_i32_30 = arith.constant 0 : i32
    %48 = arith.cmpi ne, %47, %c0_i32_30 : i32
    scf.if %48 {
      %c0_31 = arith.constant 0 : index
      %c0_32 = arith.constant 0 : index
      %49 = vector.load %arg9[%c0_31, %c0_32] : memref<1x256xf32, #tpu.memory_space<vmem>>, vector<1x256xf32>
      %50 = vector.shape_cast %49 : vector<1x256xf32> to vector<1x1x256xf32>
      %cst_33 = arith.constant dense<0.000000e+00> : vector<1xf32>
      %51 = vector.multi_reduction <add>, %50, %cst_33 [1, 2] : vector<1x1x256xf32> to vector<1xf32>
      %52 = vector.shape_cast %51 : vector<1xf32> to vector<1x1x1xf32>
      %53 = vector.extract %52[0, 0, 0] : f32 from vector<1x1x1xf32>
      %54 = vector.broadcast %53 : f32 to vector<1x1xf32>
      %c0_34 = arith.constant 0 : index
      %c0_35 = arith.constant 0 : index
      %c0_36 = arith.constant 0 : index
      %55 = vector.load %arg8[%c0_34, %c0_35, %c0_36] : memref<1x1x1xf32, #tpu.memory_space<vmem>>, vector<1x1x1xf32>
      %56 = vector.shape_cast %55 : vector<1x1x1xf32> to vector<1x1xf32>
      %57 = vector.shape_cast %54 : vector<1x1xf32> to vector<1x1x1xf32>
      tpu.vector_store %arg8[%c0_34, %c0_35, %c0_36], %57 {strides = array<i32>} : memref<1x1x1xf32, #tpu.memory_space<vmem>>, vector<1x1x1xf32>,
    } else {
    }
    return
  }
  func.func @transform_0(%arg0: i32, %arg1: i32) -> (i32, i32, i32) {
    %c0_i32 = arith.constant 0 : i32
    %c0_i32_0 = arith.constant 0 : i32
    return %arg0, %c0_i32, %arg1 : i32, i32, i32
  }
  func.func @transform_1(%arg0: i32, %arg1: i32) -> (i32, i32) {
    %c0_i32 = arith.constant 0 : i32
    %c0_i32_0 = arith.constant 0 : i32
    %c0_i32_1 = arith.constant 0 : i32
    return %c0_i32, %c0_i32_0 : i32, i32
  }
  func.func @transform_2(%arg0: i32, %arg1: i32) -> (i32, i32) {
    %c0_i32 = arith.constant 0 : i32
    %c0_i32_0 = arith.constant 0 : i32
    %c0_i32_1 = arith.constant 0 : i32
    return %c0_i32, %c0_i32_0 : i32, i32
  }
  func.func @transform_3(%arg0: i32, %arg1: i32) -> (i32, i32, i32) {
    %c0_i32 = arith.constant 0 : i32
    %c0_i32_0 = arith.constant 0 : i32
    return %arg0, %c0_i32, %arg1 : i32, i32, i32
  }
  func.func @transform_4(%arg0: i32, %arg1: i32) -> (i32, i32, i32) {
    %c0_i32 = arith.constant 0 : i32
    %c0_i32_0 = arith.constant 0 : i32
    return %arg0, %c0_i32, %arg1 : i32, i32, i32
  }
  func.func @transform_5(%arg0: i32, %arg1: i32) -> (i32, i32, i32) {
    %c0_i32 = arith.constant 0 : i32
    %c0_i32_0 = arith.constant 0 : i32
    %c0_i32_1 = arith.constant 0 : i32
    return %arg0, %c0_i32, %c0_i32_0 : i32, i32, i32
  }
  func.func @transform_6(%arg0: i32, %arg1: i32) -> (i32, i32, i32) {
    %c0_i32 = arith.constant 0 : i32
    %c0_i32_0 = arith.constant 0 : i32
    %c0_i32_1 = arith.constant 0 : i32
    return %arg0, %c0_i32, %c0_i32_0 : i32, i32, i32
  }
}

</mosaic_0001>

<bundles_post_ra>
// kernel: tpu_custom_call.1
= control target key start
LH: loop header
LB: loop body
LE: loop exit
PB: predicated region body
PF: predicated region fallthrough
CT: control target
= control target key end

     0   :  { %s1477_s0 = inlined_call_operand.vmem [shape: f32[2,4,256], index: 0, kind: input, shape index: {}]   ;;  %s1478_s1 = inlined_call_operand.vmem [shape: f32[16,4], index: 1, kind: input, shape index: {}]   ;;  %s1479_s2 = inlined_call_operand.vmem [shape: f32[16,1], index: 2, kind: input, shape index: {}]   ;;  %s1480_s3 = inlined_call_operand.hbm [shape: f32[2,4,256], index: 3, kind: output, shape index: {0}]   ;;  %s1481_s4 = inlined_call_operand.hbm [shape: s32[2,1,256], index: 4, kind: output, shape index: {1}]   ;;  %s1482_s5 = inlined_call_operand.vmem [shape: f32[2,16,5], index: 5, kind: output, shape index: {2}]   ;;  %s1483_s6 = inlined_call_operand.vmem [shape: f32[2,1,1], index: 6, kind: output, shape index: {3}]  }
   0x1   :  { %1484 = sst [smem:[#allocation9_spill]] %s1477_s0 }
   0x2   :  { %1485 = sst [smem:[#allocation10_spill]] %s1478_s1 }
   0x3   :  { %12 = vsyncpa [#allocation4], 0 }
   0x4   :  { %14 = vsyncpa [#allocation4 + $0x1], 0 }
   0x5   :  { %15 = vsyncpa [#allocation6], 0 }
   0x6   :  { %17 = vsyncpa [#allocation6 + $0x1], 0  ;;  %s1253_s21 = smov 0   ;;  %s1255_s22 = smov 0  }
   0x7   :  { %s1257_s23 = smov 0   ;;  %s1259_s24 = smov 0  }
   0x8   :  { %s1261_s25 = smov 0   ;;  %s1263_s26 = smov 0  }
   0x9 LB: > { %s986_s27 = sadd.s32 4294967295, %s1209_s26   ;;  %s987_s28 = sadd.s32 4294967294, %s1209_s26   ;;  %s1209_s26 = sphi %s1263_s26, %s23_s26   ;;  %s1205_s25 = sphi %s1261_s25, %s1496_s25   ;;  %s1201_s24 = sphi %s1259_s24, %s1495_s24   ;;  %s1197_s23 = sphi %s1257_s23, %s1494_s23   ;;  %s1193_s22 = sphi %s1255_s22, %s1493_s22   ;;  %s1189_s21 = sphi %s1253_s21, %s1492_s21  }
   0xa   : > { %s35_s29 = sadd.s32 1, %s1205_s25  ;;  %s114_s30 = sadd.s32 1, %s1197_s23 }
   0xb   : > { %p37_p0 = scmp.ge.s32.totalorder %s35_s29, 2  ;;  %p124_p1 = scmp.ne.s32.totalorder %s1197_s23, %s1193_s22 }
   0xc   : > { %p125_p2 = scmp.eq.s32.totalorder %s986_s27, 1  ;;  %p130_p3 = scmp.ne.s32.totalorder %s1193_s22, %s1189_s21 }
   0xd   : > { %s1498_s29 = smov (%p37_p0, %s35_s29), 0  ;;  %p131_p5 = scmp.eq.s32.totalorder %s987_s28, 1 }
   0xe   : > { %p1293_p4 = por %p125_p2, %p124_p1  ;;  %s109_s8 = ssub.s32 %s1205_s25, %s1498_s29 }
   0xf   : > { %p990_p6 = scmp.ge.s32.totalorder %s1209_s26, 1  ;;  %p112_p7 = scmp.eq.s32.totalorder %s109_s8, 0 }
  0x10   : > { %p1300_p8 = por %p131_p5, %p130_p3  ;;  %p248_p9 = scmp.lt.s32.totalorder %s1209_s26, 3 }
  0x11   : > { %s1306_s10 = scalar_select %p112_p7, %s1197_s23, %s114_s30  }
  0x12   : > { %p249_p10 = pnand %p990_p6, %p248_p9 }
  0x13   : > { %p296_p11 = scmp.lt.s32.totalorder (!%p249_p10), %s1201_s24, 1  ;;  %v425_v0 = vlaneseq (!%p249_p10)  ;;  %s1488_s1 = sld [smem:[#allocation10_spill]] (!%p249_p10)  ;;  %v1211_v2 = vmov (!%p249_p10), 0.0   ;;  %v318_v3 = vld [vmem:[%s1479_s2] sm:$0xff] (!%p249_p10)  ;;  %v1212_v5 = vmov (!%p249_p10), 0   ;;  %v319_v7 = vld [vmem:[%s1479_s2 + $0x8] sm:$0xff] (!%p249_p10) }
  0x14   : > { %252 = sbr.rel (%p249_p10) target bundleno = 748 (0x2ec), region = 32  ;;  %398 = vmatprep.mubr.f32.mxu0 (!%p249_p10), %v1211_v2  ;;  %1097 = vset.pattern.permute.xlu0 (!%p249_p10), %v1212_v5  ;;  %s1491_s0 = sld [smem:[#allocation9_spill]] (!%p249_p10)  ;;  %vm329_vm1 = vcmask (!%p249_p10), 1043456   ;;  %vm322_vm2 = vcmask (!%p249_p10), 31744   ;;  %vm620_vm3 = vcmask (!%p249_p10), 39936   ;;  %v1214_v61 = vmov (!%p249_p10), 1.0  }
  0x15   : > { %vm1318_vm0 = vcmp.lt.s32.totalorder (!%p249_p10), %v425_v0, 256  ;;  %413 = vperm.xlu0 (!%p249_p10), %1097, %v318_v3   ;;  %v1358_v29 = vshrl.u32 (!%p249_p10), %v425_v0, 7  ;;  %v1213_v47 = vmov (!%p249_p10), 1966171168   ;;  %s1364_s14 = sand.u32 (!%p249_p10), 1, %s1193_s22   ;;  %s1024_s20 = sshll.u32 (!%p249_p10), %s1201_s24, 7 }
  0x16   : > { %623 = vst.msk [vmem:[#allocation2] sm:$0x3] (!%p249_p10), %vm1318_vm0, %v1211_v2  ;;  %v598_v48 = vunpack.c.l.s4 (!%p249_p10), %v1213_v47  ;;  %v1215_v63 = vmov (!%p249_p10), 1.0|1.0   ;;  %s991_s18 = sshll.u32 (!%p249_p10), %s1364_s14, 3  ;;  %s780_s11 = scalar_lea.sflag (!%p249_p10), [#allocation4], %s1364_s14 }
  0x17   : > { %v427_v34 = vadd.s32 (!%p249_p10), 8, %v1358_v29  ;;  %s1390_s19 = scalar_lea.vmem (!%p249_p10), [#allocation3], %s991_s18 }
  0x18   : > { %v599_v53 = vunpack.c.0.s8 (!%p249_p10), %v598_v48  ;;  %s809_s27 = sshll.u32 (!%p249_p10), %s1390_s19, 4  ;;  %s810_s27 = int_to_ptr.vmem [resolvable:$true] %s809_s27 }
  0x19   : > { %v316_v1 = vld [vmem:[%s1488_s1] sm:$0xff] (!%p249_p10)  ;;  %v317_v6 = vld [vmem:[%s1488_s1 + $0x8] sm:$0xff] (!%p249_p10)  ;;  %418 = vperm.xlu0 (!%p249_p10), %1097, %v319_v7   ;;  %s1099_s12 = scalar_lea.vmem (!%p249_p10), %s810_s27, 128 }
  0x1a   : > { %484 = vxpose.xlu1.b32.start [1/2] (short) (narrow) (!%p249_p10), %v316_v1, 8  ;;  %v1367_v58 = vsub.s32 (!%p249_p10), %v599_v53, %v1358_v29  ;;  %p1100_p12 = scmp.ne.s32.totalorder (!%p249_p10), %s810_s27, %s1099_s12 }
  0x1b   : > { %s1316_s15 = scalar_select %p296_p11, %s1201_s24, 1 }
  0x1c   : > { %p1101_p13 = pnand %p1100_p12, %p1293_p4 }
  0x1d   : > { %s1022_s16 = sshll.u32 %s1316_s15, 3  ;;  %s1023_s8 = sshll.u32 %s1316_s15, 4 }
  0x1e   : > { %s303_s30 = scalar_lea.vmem %s1491_s0, %s1022_s16  ;;  %485 = vxpose.xlu1.b32.end [2/2] (short) (narrow) %v317_v6, 8  ;;  %s1352_s13 = scalar_lea.vmem %s1482_s5, %s1023_s8 }
  0x1f   : > { %v1334_v8 = vld [vmem:[%s303_s30] sm:$0xff]  ;;  %621 = vst.msk [vmem:[%s1352_s13] sm:$0xff] %vm620_vm3, %v1211_v2  ;;  %622 = vst.msk [vmem:[%s1352_s13 + $0x8] sm:$0xff] %vm620_vm3, %v1211_v2  ;;  %s992_s16 = sshll.u32 %s1364_s14, 1  ;;  %s1406_s8 = scalar_lea.hbm %s1480_s3, %s1024_s20 }
  0x20   : > { %v1338_v9 = vcombine.high %v1334_v8, %v1334_v8  ;;  %v625_v11 = vsel %vm329_vm1, %v1334_v8, 1.0  ;;  %s1376_s17 = scalar_lea.vmem [#allocation5], %s992_s16  ;;  %p1102_p0 = pneg %p1101_p13 }
  0x22   : > { %997 = vmatprep.subr.msk.mxu0 %vm329_vm1, %v1338_v9  ;;  %v626_v10 = vsel %vm329_vm1, %v1338_v9, 1.0 }
  0x23   : > { %998 = vmatpush1.msk.msra.mxu0 %vm329_vm1, %v1334_v8  ;;  %629 = vmatprep.subr.mxu1 %v626_v10 }
  0x24   : > { %999 = vmatmul.mubr.msk.f32.vlgmr.msra.gmra.mrb[0].mxu0 %vm322_vm2, %v316_v1  ;;  %630 = vmatpush1.xpose.msra.mxu1 %v625_v11 }
  0x25   : > { %404 = vmatprep.mubr.f32.mxu0 %v1211_v2 }
  0x26   : > { %v628_v7 = vld [vmem:[%s1352_s13 + $0x8] sm:$0xff] }
  0x28   : > { %1000 = vmatmul.mubr.msk.f32.gmra.mrb[2].mxu0 %vm322_vm2, %v317_v6 }
  0x29   : > { %584 = vmatprep.mubr.f32.mxu0 %v1211_v2  ;;  %v627_v2 = vld [vmem:[%s1352_s13] sm:$0xff] }
  0x94   : > { %v414_v12 = vpop.permute.xlu0 %413 }
  0x98   : > { %v419_v15 = vpop.permute.xlu0 %418 }
  0x9a   : > { %v500_v0 = vpop.trf.xlu1 }
  0xf7   : > { %v400_v13 = vpop.f32.mrb[0].mxu0 }
  0xf8   : > { %v402_v14 = vpop.f32.mrb[1].mxu0  ;;  %v421_v17 = vsub.f32 %v414_v12, %v400_v13 }
  0xf9   : > { %v422_v20 = vsub.f32 %v414_v12, %v402_v14 }
  0xfb   : > { %v406_v16 = vpop.f32.mrb[2].mxu0 }
  0xfc   : > { %v423_v18 = vsub.f32 %v419_v15, %v406_v16  ;;  %v408_v19 = vpop.f32.mrb[3].mxu0 }
  0xfd   : > { %v424_v21 = vsub.f32 %v419_v15, %v408_v19 }
  0xfe   : > { %v428_v22 = vmin.f32 %v421_v17, %v423_v18 }
  0xff   : > { %v435_v23 = vmin.f32 %v422_v20, %v424_v21 }
 0x100   : > { %v429_v24 = vrot.slane %v428_v22, 4 }
 0x101   : > { %v436_v25 = vrot.slane %v435_v23, 4 }
 0x102   : > { %v430_v26 = vmin.f32 %v428_v22, %v429_v24 }
 0x103   : > { %v437_v27 = vmin.f32 %v435_v23, %v436_v25 }
 0x104   : > { %v431_v28 = vrot.slane %v430_v26, 2 }
 0x105   : > { %v438_v30 = vrot.slane %v437_v27, 2 }
 0x106   : > { %v432_v31 = vmin.f32 %v430_v26, %v431_v28 }
 0x107   : > { %v439_v32 = vmin.f32 %v437_v27, %v438_v30 }
 0x108   : > { %v433_v33 = vrot.slane %v432_v31, 1 }
 0x109   : > { %v440_v35 = vrot.slane %v439_v32, 1 }
 0x10a   : > { %v434_v36 = vmin.f32 %v432_v31, %v433_v33 }
 0x10b   : > { %v441_v37 = vmin.f32 %v439_v32, %v440_v35  ;;  %v711_v35 = vld [vmem:[#allocation2] sm:$0x3] }
 0x10c   : > { %vm442_vm4 = vcmp.eq.f32.partialorder %v421_v17, %v434_v36  ;;  %vm444_vm5 = vcmp.eq.f32.partialorder %v423_v18, %v434_v36 }
 0x10d   : > { %v446_v38 = vsel %vm442_vm4, %v1358_v29, 16  ;;  %v448_v39 = vsel %vm444_vm5, %v427_v34, 16  ;;  %vm443_vm6 = vcmp.eq.f32.partialorder %v422_v20, %v441_v37  ;;  %vm445_vm7 = vcmp.eq.f32.partialorder %v424_v21, %v441_v37 }
 0x10e   : > { %vm450_vm8 = vcmp.lt.s32.totalorder %v446_v38, %v448_v39  ;;  %v447_v40 = vsel %vm443_vm6, %v1358_v29, 16  ;;  %v449_v41 = vsel %vm445_vm7, %v427_v34, 16 }
 0x10f   : > { %v451_v42 = vsel %vm450_vm8, %v446_v38, %v448_v39  ;;  %vm461_vm9 = vcmp.lt.s32.totalorder %v447_v40, %v449_v41  ;;  %v755_v38 = vsub.s32 0, %v1358_v29  ;;  %v759_v39 = vsub.s32 1, %v1358_v29 }
 0x110   : > { %v452_v43 = vrot.slane %v451_v42, 4  ;;  %v462_v44 = vsel %vm461_vm9, %v447_v40, %v449_v41  ;;  %vm516_vm9 = vcmask 130048  }
 0x111   : > { %v463_v45 = vrot.slane %v462_v44, 4 }
 0x112   : > { %vm453_vm10 = vcmp.lt.s32.totalorder %v451_v42, %v452_v43 }
 0x113   : > { %v454_v46 = vsel %vm453_vm10, %v451_v42, %v452_v43  ;;  %vm464_vm11 = vcmp.lt.s32.totalorder %v462_v44, %v463_v45 }
 0x114   : > { %v455_v49 = vrot.slane %v454_v46, 2  ;;  %v465_v50 = vsel %vm464_vm11, %v462_v44, %v463_v45 }
 0x115   : > { %v466_v51 = vrot.slane %v465_v50, 2 }
 0x116   : > { %vm456_vm12 = vcmp.lt.s32.totalorder %v454_v46, %v455_v49 }
 0x117   : > { %v457_v52 = vsel %vm456_vm12, %v454_v46, %v455_v49  ;;  %vm467_vm13 = vcmp.lt.s32.totalorder %v465_v50, %v466_v51 }
 0x118   : > { %v458_v54 = vrot.slane %v457_v52, 1  ;;  %v468_v55 = vsel %vm467_vm13, %v465_v50, %v466_v51 }
 0x119   : > { %v469_v56 = vrot.slane %v468_v55, 1 }
 0x11a   : > { %vm459_vm14 = vcmp.lt.s32.totalorder %v457_v52, %v458_v54 }
 0x11b   : > { %v460_v57 = vsel %vm459_vm14, %v457_v52, %v458_v54  ;;  %vm470_vm15 = vcmp.lt.s32.totalorder %v468_v55, %v469_v56 }
 0x11c   : > { %v471_v59 = vsel %vm470_vm15, %v468_v55, %v469_v56  ;;  %vm472_vm2 = vcmp.eq.s32.totalorder %v1358_v29, %v460_v57  ;;  %vm474_vm4 = vcmp.eq.s32.totalorder %v427_v34, %v460_v57 }
 0x11d   : > { %vm473_vm5 = vcmp.eq.s32.totalorder %v1358_v29, %v471_v59  ;;  %vm475_vm6 = vcmp.eq.s32.totalorder %v427_v34, %v471_v59  ;;  %v596_v60 = vcombine.low %v460_v57, %v471_v59  ;;  %vm1028_vm8 = vmpackc.low %vm474_vm4, %vm472_vm2 }
 0x11e   : > { %vm1026_vm7 = vmpackc.low %vm475_vm6, %vm473_vm5  ;;  %1010 = vmatprep.mubr.msk.f32.mxu1 %vm473_vm5, %v1214_v61 }
 0x11f   : > { %v603_v62 = vrot.slane %v596_v60, %v1367_v58  ;;  %1027 = vmatprep.subr.msk.bf16.mxu0 %vm1026_vm7, %v1215_v63  ;;  %1011 = vmatmul.mubr.msk.f32.vlgmr.msra.gmra.mrb[0].mxu1 %vm472_vm2, %v1214_v61 }
 0x120   : > { %1029 = vmatpush1.bf16.msk.msra.mxu0 %vm1028_vm8, %v1215_v63  ;;  %1012 = vmatprep.mubr.msk.f32.mxu1 %vm475_vm6, %v1214_v61 }
 0x121   : > { %v610_v1 = vrot.slane %v603_v62, %v1367_v58 }
 0x123   : > { %1009 = vmatmul.mubr.msk.f32.vlgmr.msra.gmra.mrb[4].mxu0 %vm516_vm9, %v500_v0  ;;  %1013 = vmatmul.mubr.msk.f32.gmra.mrb[2].mxu1 %vm474_vm4, %v1214_v61  ;;  %615 = vst.msk [vmem:[%s1376_s17] sm:$0x3] %vm1318_vm0, %v610_v1 }
 0x1f2   : > { %v695_v3 = vpop.f32.mrb[0].mxu1 }
 0x1f3   : > { %v704_v5 = vadd.f32 %v695_v3, %v627_v2  ;;  %v697_v6 = vpop.f32.mrb[1].mxu1 }
 0x1f5   : > { %707 = vst.msk [vmem:[%s1352_s13] sm:$0xff] %vm620_vm3, %v704_v5 }
 0x1f6   : > { %v586_v10 = vpop.f32.mrb[4].mxu0  ;;  %v700_v11 = vpop.f32.mrb[2].mxu1 }
 0x1f7   : > { %v709_v12 = vsub.f32 %v586_v10, %v1334_v8  ;;  %v705_v13 = vadd.f32 %v700_v11, %v628_v7  ;;  %v588_v14 = vpop.f32.mrb[5].mxu0  ;;  %v702_v15 = vpop.f32.mrb[3].mxu1 }
 0x1f8   : > { %v593_v16 = vcombine.low %v586_v10, %v588_v14  ;;  %v710_v17 = vsub.f32 %v588_v14, %v1338_v9 }
 0x1f9   : > { %v712_v18 = vmul.f32 %v709_v12, %v709_v12  ;;  %708 = vst.msk [vmem:[%s1352_s13 + $0x8] sm:$0xff] %vm620_vm3, %v705_v13  ;;  %s1216_s13 = smov [#allocation3]  }
 0x1fa   : > { %595 = vst [vmem:[%s1390_s19] sm:$0xff] %v593_v16  ;;  %v713_v19 = vmul.f32 %v710_v17, %v710_v17  ;;  %s1103_s16 = sshll.u32 %s1216_s13, 4  ;;  %s1104_s16 = int_to_ptr.vmem [resolvable:$false] %s1103_s16 }
 0x1fb   : > { %v714_v20 = vsel %vm329_vm1, %v712_v18, 0.0  ;;  %s1105_s18 = scalar_lea.vmem %s1104_s16, 256  ;;  %p1106_p1 = scmp.lt.s32.totalorder %s810_s27, %s1104_s16 }
 0x1fc   : > { %v715_v21 = vrot.slane %v714_v20, 4  ;;  %v721_v22 = vsel %vm329_vm1, %v713_v19, 0.0  ;;  %vm763_vm1 = vcmask 1040384   ;;  %p1107_p2 = scmp.lt.s32.totalorder %s1105_s18, %s1099_s12 }
 0x1fd   : > { %v722_v8 = vrot.slane %v721_v22, 4 }
 0x1fe   : > { %v716_v23 = vadd.f32 %v715_v21, %v714_v20  ;;  %p1108_p3 = por %p1107_p2, %p1106_p1 }
 0x1ff   : > { %v723_v24 = vadd.f32 %v722_v8, %v721_v22 }
 0x200   : > { %v717_v25 = vrot.slane %v716_v23, 2  ;;  %p1109_p5 = pnand %p1108_p3, %p1102_p0 }
 0x201   : > { %v724_v26 = vrot.slane %v723_v24, 2 }
 0x202   : > { %v718_v27 = vadd.f32 %v717_v25, %v716_v23 }
 0x203   : > { %v725_v9 = vadd.f32 %v724_v26, %v723_v24 }
 0x204   : > { %v719_v28 = vrot.slane %v718_v27, 1 }
 0x205   : > { %v726_v30 = vrot.slane %v725_v9, 1 }
 0x206   : > { %v720_v31 = vadd.f32 %v719_v28, %v718_v27 }
 0x207   : > { %v727_v32 = vadd.f32 %v726_v30, %v725_v9 }
 0x209   : > { %v730_v33 = vcombine.low %v720_v31, %v727_v32 }
 0x20b   : > { %v737_v34 = vrot.slane %v730_v33, %v1367_v58 }
 0x20d   : > { %v744_v36 = vrot.slane %v737_v34, %v1367_v58 }
 0x20f   : > { %v746_v37 = vadd.f32 %v744_v36, %v711_v35 }
 0x211   : > { %747 = vst.msk [vmem:[#allocation2] sm:$0x3] %vm1318_vm0, %v746_v37 }
 0x218   : > { %v751_v40 = vld [vmem:[#allocation2] sm:$0x3] }
 0x219   : > { %v756_v41 = vrot.slane %v751_v40, %v755_v38  ;;  %v760_v42 = vrot.slane %v751_v40, %v759_v39 }
 0x21b   : > { %v764_v43 = vsel %vm763_vm1, %v756_v41, 0.0  ;;  %v765_v44 = vsel %vm763_vm1, %v760_v42, 0.0 }
 0x21c   : > { %v766_v45 = vadd.f32 %v765_v44, %v764_v43 }
 0x21e   : > { %767 = vadd.xlane.f32.xlu0 %v766_v45 }
 0x21f   : > { %1112 = shalt.err (!%p1109_p5)
}
 0x220   : > { %s1113_s19 = scalar_lea.hbm %s1406_s8, 128  ;;  %s1117_s30 = scalar_lea.hbm %s1480_s3, 256 }
 0x221   : > { %p1114_p6 = scmp.ne.s32.totalorder %s1406_s8, %s1113_s19  ;;  %p1118_p10 = scmp.lt.u32.totalorder %s1406_s8, %s1480_s3 }
 0x222   : > { %p1119_p11 = scmp.lt.u32.totalorder %s1117_s30, %s1113_s19  ;;  %p1121_p13 = scmp.lt.u32.totalorder %s1113_s19, %s1406_s8 }
 0x223   : > { %p1115_p7 = pnand %p1114_p6, %p1293_p4 }
 0x224   : > { %p1120_p12 = por %p1119_p11, %p1118_p10 }
 0x225   : > { %p1116_p9 = pneg %p1115_p7 }
 0x226   : > { %p1122_p0 = por %p1121_p13, %p1120_p12 }
 0x228   : > { %p1123_p1 = pnand %p1122_p0, %p1116_p9 }
 0x22a   : > { %1126 = shalt.err (!%p1123_p1)
}
 0x22b   : > { %1032 = dma.vmem_to_hbm [thread:$0]  (%p1293_p4), %s810_s27, 128, %s1406_s8, %s780_s11  }
 0x22c   : > { %s1025_s12 = sshll.u32 %s1201_s24, 5  ;;  %s825_s18 = sshll.u32 %s1376_s17, 4  ;;  %s826_s18 = int_to_ptr.vmem [resolvable:$true] %s825_s18 }
 0x22d   : > { %s1431_s13 = scalar_lea.hbm %s1481_s4, %s1025_s12  ;;  %s785_s19 = scalar_lea.sflag [#allocation6], %s1364_s14 }
 0x22e   : > { %s1127_s30 = scalar_lea.vmem %s826_s18, 32  ;;  %s1217_s16 = smov [#allocation5]  }
 0x22f   : > { %p1128_p2 = scmp.ne.s32.totalorder %s826_s18, %s1127_s30  ;;  %s1131_s0 = sshll.u32 %s1217_s16, 4  ;;  %s1132_s0 = int_to_ptr.vmem [resolvable:$false] %s1131_s0 }
 0x230   : > { %s1133_s1 = scalar_lea.vmem %s1132_s0, 64  ;;  %p1134_p6 = scmp.lt.s32.totalorder %s826_s18, %s1132_s0 }
 0x231   : > { %p1129_p3 = pnand %p1128_p2, %p1293_p4  ;;  %p1135_p7 = scmp.lt.s32.totalorder %s1133_s1, %s1127_s30 }
 0x233   : > { %p1130_p5 = pneg %p1129_p3  ;;  %p1136_p9 = por %p1135_p7, %p1134_p6 }
 0x235   : > { %p1137_p10 = pnand %p1136_p9, %p1130_p5 }
 0x237   : > { %1140 = shalt.err (!%p1137_p10)
}
 0x238   : > { %s1141_s24 = scalar_lea.hbm %s1431_s13, 32  ;;  %s1145_s27 = scalar_lea.hbm %s1481_s4, 64 }
 0x239   : > { %p1142_p11 = scmp.ne.s32.totalorder %s1431_s13, %s1141_s24  ;;  %p1146_p0 = scmp.lt.u32.totalorder %s1431_s13, %s1481_s4 }
 0x23a   : > { %p1147_p1 = scmp.lt.u32.totalorder %s1145_s27, %s1141_s24  ;;  %p1149_p3 = scmp.lt.u32.totalorder %s1141_s24, %s1431_s13 }
 0x23b   : > { %p1143_p12 = pnand %p1142_p11, %p1293_p4 }
 0x23c   : > { %p1148_p2 = por %p1147_p1, %p1146_p0 }
 0x23d   : > { %p1144_p13 = pneg %p1143_p12 }
 0x23e   : > { %p1150_p5 = por %p1149_p3, %p1148_p2 }
 0x240   : > { %p1151_p6 = pnand %p1150_p5, %p1144_p13 }
 0x242   : > { %1154 = shalt.err (!%p1151_p6)
}
 0x243   : > { %1033 = dma.vmem_to_hbm [thread:$0]  (%p1293_p4), %s826_s18, 32, %s1431_s13, %s785_s19   ;;  %vm777_vm0 = vcmask 0  }
 0x244   : > { %s314_s12 = scalar_lea.vmem %s1483_s6, %s1316_s15 }
 0x2ab   : > { %v768_v4 = vpop.xlane.xlu0 %767 }
 0x2ac   : > { %v769_v29 = vrot.slane %v768_v4, 4 }
 0x2ae   : > { %v770_v46 = vadd.f32 %v769_v29, %v768_v4 }
 0x2b0   : > { %v771_v47 = vrot.slane %v770_v46, 2 }
 0x2b2   : > { %v772_v48 = vadd.f32 %v771_v47, %v770_v46 }
 0x2b4   : > { %v773_v49 = vrot.slane %v772_v48, 1 }
 0x2b6   : > { %v774_v50 = vadd.f32 %v773_v49, %v772_v48 }
 0x2b8   : > { %1030 = vpush %v774_v50 }
 0x2e9   : > { %s1031_s20 = spop %1030 }
 0x2ea   : > { %v776_v51 = vstv %s1031_s20 }
 0x2eb   : > { %778 = vst.msk [vmem:[%s314_s12] sm:$0x1] %vm777_vm0, %v776_v51 }
 0x2ec PF: > { %p1043_p4 = scmp.ge.s32.totalorder %s1209_s26, 2  ;;  %s843_s7 = sand.u32 1, %s1189_s21  }
 0x2ed   : > { %s844_s18 = scalar_lea.sflag [#allocation4], %s843_s7 }
 0x2ee   : > { %p1037_p7 = pnand %p1043_p4, %p1300_p8 }
 0x2f0   : > { %1180 = dma.done.wait (!%p1037_p7), %s844_s18, 128  }
 0x2f1   : > { %1182 = vsyncadd (!%p1037_p7), %s844_s18, 4294967168  ;;  %s853_s28 = scalar_lea.sflag [#allocation6], %s843_s7 }
 0x2f2   : > { %1184 = dma.done.wait (!%p1037_p7), %s853_s28, 32  }
 0x2f3   : > { %1186 = vsyncadd (!%p1037_p7), %s853_s28, 4294967264  ;;  %s23_s26 = sadd.s32 1, %s1209_s26   ;;  %s1492_s21 = smov %s1193_s22 }
 0x2f4   : > { %p20_p9 = scmp.ge.s32.totalorder %s23_s26, 4   ;;  %s1493_s22 = smov %s1197_s23 }
 0x2f5   : > { %s1494_s23 = smov %s1306_s10  ;;  %s1495_s24 = smov %s1205_s25 }
 0x2f6   : > { %s1496_s25 = smov %s1498_s29  ;;  %22 = sbr.rel (!%p20_p9) target bundleno = 9 (0x9), region = 116 }
 0x2fd   :  { %872 = vsyncpa [#allocation4], 1 }
 0x2fe   :  { %874 = vsyncpa [#allocation4 + $0x1], 1 }
 0x2ff   :  { %875 = vsyncpa [#allocation6], 1 }
 0x300   :  { %877 = vsyncpa [#allocation6 + $0x1], 1 }

</bundles_post_ra>
